<compile_context>
chip_gen: v5e
topology: v5e:2x2
jax: 0.10.0
libtpu: 0.0.40
codegen_flags: <defaults>
</compile_context>

<pallas_src>
import jax
import jax.numpy as jnp
from jax.experimental import pallas as pl
from jax.experimental.pallas import tpu as pltpu


def _round_up(x, m):
    return ((x + m - 1) // m) * m


def _cdiv(a, b):
    return (a + b - 1) // b


def _encoder_kernel(x_ref, w1_ref, b1_ref, w2_ref, b2_ref, out_ref):
    # Cast the f32 activations to bf16 in-registers to feed the MXU.
    x = x_ref[...].astype(w1_ref.dtype)
    # fc1: bf16 MXU matmul, f32 accumulate; bias + ReLU in f32 on the VPU.
    h = jnp.dot(x, w1_ref[...], preferred_element_type=jnp.float32)
    h = jnp.maximum(h + b1_ref[...], 0.0)            # (tm, H) + (1, H)
    # fc2: cast the f32 intermediate back to bf16 only for the MXU operand.
    z = jnp.dot(h.astype(w2_ref.dtype), w2_ref[...],
                preferred_element_type=jnp.float32)
    z = jnp.maximum(z + b2_ref[...], 0.0)            # (tm, L) + (1, L)
    out_ref[...] = z.astype(out_ref.dtype)


def prepare_encoder_params(w1, b1, w2, b2):
    """One-time parameter prep: bf16 MXU weights, f32 row-vector biases.

    w1: (input_size, hidden_dim)   (pre-transposed vs. torch Linear)
    b1: (hidden_dim,)
    w2: (hidden_dim, latent_size)
    b2: (latent_size,)
    """
    return (jnp.asarray(w1, jnp.bfloat16),
            jnp.asarray(b1, jnp.float32).reshape(1, -1),
            jnp.asarray(w2, jnp.bfloat16),
            jnp.asarray(b2, jnp.float32).reshape(1, -1))


def _default_vmem_limit():
    # Derive a safe scoped-VMEM budget per generation: ~3/4 of physical
    # capacity (leaves compiler scratch/spill headroom on v7x's 64 MiB),
    # capped at 96 MiB for v5e/v6e's 128 MiB.
    try:
        cap = pltpu.get_tpu_info().vmem_capacity_bytes
        return int(min(cap * 3 // 4, 96 << 20))
    except Exception:
        return 48 << 20   # conservative: fits every generation


def encoder_forward(x, params, *, block_m=1024, vmem_limit_bytes=None):
    """Forward pass of the PyTorch Encoder.

    x      : any shape whose elements flatten to (-1, input_size).
    params : output of prepare_encoder_params().
    Returns: float32 (batch, latent_size)
    """
    w1, b1, w2, b2 = params
    input_size, hidden_dim = w1.shape
    latent_size = w2.shape[1]
    assert w2.shape[0] == hidden_dim

    x2d = x.reshape(-1, input_size)          # view only; no data movement
    n = x2d.shape[0]

    if vmem_limit_bytes is None:
        vmem_limit_bytes = _default_vmem_limit()

    # --- residency guard -----------------------------------------------
    # Both weight matrices stay resident across the whole grid.
    # TODO(synk): add a hidden/K reduction grid axis ("arbitrary") with an
    # f32 accumulator scratch for weights too large to stay resident.
    weight_resident = (w1.size * w1.dtype.itemsize + w2.size * w2.dtype.itemsize
                       + b1.size * b1.dtype.itemsize + b2.size * b2.dtype.itemsize)
    if 2 * weight_resident > vmem_limit_bytes:     # conservative (double-buffered)
        raise ValueError(
            f"fc1/fc2 weights ({weight_resident} B) do not fit resident in the "
            f"VMEM budget ({vmem_limit_bytes} B); hidden-dim tiling not implemented.")

    # --- batch tile ------------------------------------------------------
    # Multiple of 8 sublanes; target >= 2 grid steps (v7x has 2 TensorCores);
    # capped by block_m.  Larger tm amortizes per-grid-step overhead.
    tm = min(block_m, _round_up(max(_cdiv(n, 2), 1), 8))
    tm = max(tm, 8)

    def _tile_bytes(tm_):
        return (2 * tm_ * input_size * x2d.dtype.itemsize   # x tile (double-buffered)
                + 2 * tm_ * latent_size * 4                 # out tile (double-buffered)
                + 2 * tm_ * hidden_dim * 4)                 # f32 intermediate + headroom

    while tm > 8 and 2 * weight_resident + _tile_bytes(tm) > vmem_limit_bytes:
        tm = max(8, _round_up(tm // 2, 8))

    grid = (_cdiv(n, tm),)

    # --- honest cost estimate (real HBM bytes after the traffic fixes) ---
    cost = pl.CostEstimate(
        flops=2 * n * (input_size * hidden_dim + hidden_dim * latent_size),
        transcendentals=0,
        bytes_accessed=(x2d.size * x2d.dtype.itemsize
                        + weight_resident
                        + n * latent_size * 4))

    def _run(weight_pipeline_mode):
        def wspec(shape):
            if weight_pipeline_mode is None:
                return pl.BlockSpec(shape, lambda i: (0, 0))
            return pl.BlockSpec(shape, lambda i: (0, 0),
                                pipeline_mode=weight_pipeline_mode)

        return pl.pallas_call(
            _encoder_kernel,
            out_shape=jax.ShapeDtypeStruct((n, latent_size), jnp.float32),
            grid_spec=pltpu.PrefetchScalarGridSpec(
                num_scalar_prefetch=0,
                grid=grid,
                in_specs=[
                    pl.BlockSpec((tm, input_size), lambda i: (i, 0)),   # x tile
                    wspec((input_size, hidden_dim)),                    # w1 (resident)
                    wspec((1, hidden_dim)),                             # b1 (resident)
                    wspec((hidden_dim, latent_size)),                   # w2 (resident)
                    wspec((1, latent_size)),                            # b2 (resident)
                ],
                out_specs=pl.BlockSpec((tm, latent_size), lambda i: (i, 0)),
            ),
            compiler_params=pltpu.CompilerParams(
                dimension_semantics=("parallel",),   # batch tiles are independent
                vmem_limit_bytes=vmem_limit_bytes,
            ),
            cost_estimate=cost,
        )(x2d, w1, b1, w2, b2)

    try:
        # Constant index_map -> the weights are DMAed once; request a single
        # VMEM buffer for them so large weights don't pay 2x residency.
        out = _run(pl.Buffered(1))
    except Exception:
        # Fallback: default double-buffering (still only DMAed once).
        out = _run(None)
    return out


def _ref_forward(x, w1, b1, w2, b2):
    x2d = x.reshape(-1, w1.shape[0]).astype(jnp.float32)
    h = jnp.maximum(x2d @ w1 + b1, 0.0)
    return jnp.maximum(h @ w2 + b2, 0.0)


if __name__ == "__main__":
    # Small, module-consistent shapes.
    input_size = 32
    hidden_dim = 64
    latent_size = 16

    key = jax.random.PRNGKey(0)
    kx, kw1, kb1, kw2, kb2, kx2 = jax.random.split(key, 6)

    # PyTorch Linear stores (out, in); we store the transposed (in, out).
    w1 = jax.random.normal(kw1, (input_size, hidden_dim), dtype=jnp.float32) * 0.1
    b1 = jax.random.normal(kb1, (hidden_dim,), dtype=jnp.float32) * 0.1
    w2 = jax.random.normal(kw2, (hidden_dim, latent_size), dtype=jnp.float32) * 0.1
    b2 = jax.random.normal(kb2, (latent_size,), dtype=jnp.float32) * 0.1

    # Parameters are cast/packed once, outside the forward path.
    params = prepare_encoder_params(w1, b1, w2, b2)

    # Case 1: multi-dim input exercised through the view(-1, input_size) path.
    x1 = jax.random.normal(kx, (2, 4, input_size), dtype=jnp.float32)
    out1 = jax.block_until_ready(encoder_forward(x1, params))
    ref1 = _ref_forward(x1, w1, b1, w2, b2)
    assert out1.shape == (8, latent_size)
    assert jnp.allclose(out1, ref1, atol=2e-2, rtol=2e-2), "case 1 mismatch"

    # Case 2: batch not a multiple of the tile — exercises a grid >= 2 and
    # masked boundary load/stores (no batch padding, no output slice).
    x2 = jax.random.normal(kx2, (300, input_size), dtype=jnp.float32)
    out2 = jax.block_until_ready(encoder_forward(x2, params))
    ref2 = _ref_forward(x2, w1, b1, w2, b2)
    assert out2.shape == (300, latent_size)
    assert jnp.allclose(out2, ref2, atol=2e-2, rtol=2e-2), "case 2 mismatch"

    print("KERNEL_OK")
</pallas_src>

<mosaic_0001>
module attributes {stable_mosaic.version = 11 : i64} {
  func.func @_encoder_kernel(%arg0: i32, %arg1: memref<8x32xf32, #tpu.memory_space<vmem>>, %arg2: memref<32x64xbf16, #tpu.memory_space<vmem>>, %arg3: memref<1x64xf32, #tpu.memory_space<vmem>>, %arg4: memref<64x16xbf16, #tpu.memory_space<vmem>>, %arg5: memref<1x16xf32, #tpu.memory_space<vmem>>, %arg6: memref<8x16xf32, #tpu.memory_space<vmem>>) attributes {dimension_semantics = [#tpu.dimension_semantics<parallel>], iteration_bounds = array<i64: 1>, scalar_prefetch = 0 : i64, scratch_operands = 0 : i64, tpu.core_type = #tpu.core_type<tc>, window_params = [{transform_indices = @transform_0, window_bounds = array<i64: 8, 32>}, {pipeline_mode = #tpu.pipeline_mode<synchronous>, transform_indices = @transform_1, window_bounds = array<i64: 32, 64>}, {pipeline_mode = #tpu.pipeline_mode<synchronous>, transform_indices = @transform_2, window_bounds = array<i64: 1, 64>}, {pipeline_mode = #tpu.pipeline_mode<synchronous>, transform_indices = @transform_3, window_bounds = array<i64: 64, 16>}, {pipeline_mode = #tpu.pipeline_mode<synchronous>, transform_indices = @transform_4, window_bounds = array<i64: 1, 16>}, {transform_indices = @transform_5, window_bounds = array<i64: 8, 16>}]} {
    %c0 = arith.constant 0 : index
    %c0_0 = arith.constant 0 : index
    %0 = vector.load %arg1[%c0, %c0_0] : memref<8x32xf32, #tpu.memory_space<vmem>>, vector<8x32xf32>
    %1 = arith.truncf %0 : vector<8x32xf32> to vector<8x32xbf16>
    %c0_1 = arith.constant 0 : index
    %c0_2 = arith.constant 0 : index
    %2 = vector.load %arg2[%c0_1, %c0_2] : memref<32x64xbf16, #tpu.memory_space<vmem>>, vector<32x64xbf16>
    %cst = arith.constant dense<0.000000e+00> : vector<8x64xf32>
    %3 = tpu.matmul %1, %2, %cst {dimension_numbers = #tpu.dot_dimension_numbers<[1], [0], [0], [1], [0, 0, 1, 1], [], []>} : vector<8x32xbf16>, vector<32x64xbf16>, vector<8x64xf32> -> vector<8x64xf32>
    %c0_3 = arith.constant 0 : index
    %c0_4 = arith.constant 0 : index
    %4 = vector.load %arg3[%c0_3, %c0_4] : memref<1x64xf32, #tpu.memory_space<vmem>>, vector<1x64xf32>
    %5 = vector.broadcast %4 : vector<1x64xf32> to vector<8x64xf32>
    %6 = arith.addf %3, %5 : vector<8x64xf32>
    %cst_5 = arith.constant 0.000000e+00 : f32
    %7 = vector.broadcast %cst_5 : f32 to vector<8x64xf32>
    %8 = arith.maximumf %6, %7 : vector<8x64xf32>
    %9 = arith.truncf %8 : vector<8x64xf32> to vector<8x64xbf16>
    %c0_6 = arith.constant 0 : index
    %c0_7 = arith.constant 0 : index
    %10 = vector.load %arg4[%c0_6, %c0_7] : memref<64x16xbf16, #tpu.memory_space<vmem>>, vector<64x16xbf16>
    %cst_8 = arith.constant dense<0.000000e+00> : vector<8x16xf32>
    %11 = tpu.matmul %9, %10, %cst_8 {dimension_numbers = #tpu.dot_dimension_numbers<[1], [0], [0], [1], [0, 0, 1, 1], [], []>} : vector<8x64xbf16>, vector<64x16xbf16>, vector<8x16xf32> -> vector<8x16xf32>
    %c0_9 = arith.constant 0 : index
    %c0_10 = arith.constant 0 : index
    %12 = vector.load %arg5[%c0_9, %c0_10] : memref<1x16xf32, #tpu.memory_space<vmem>>, vector<1x16xf32>
    %13 = vector.broadcast %12 : vector<1x16xf32> to vector<8x16xf32>
    %14 = arith.addf %11, %13 : vector<8x16xf32>
    %cst_11 = arith.constant 0.000000e+00 : f32
    %15 = vector.broadcast %cst_11 : f32 to vector<8x16xf32>
    %16 = arith.maximumf %14, %15 : vector<8x16xf32>
    %c0_12 = arith.constant 0 : index
    %c0_13 = arith.constant 0 : index
    %17 = vector.load %arg6[%c0_12, %c0_13] : memref<8x16xf32, #tpu.memory_space<vmem>>, vector<8x16xf32>
    tpu.vector_store %arg6[%c0_12, %c0_13], %16 {strides = array<i32>} : memref<8x16xf32, #tpu.memory_space<vmem>>, vector<8x16xf32>,
    return
  }
  func.func @transform_0(%arg0: i32) -> (i32, i32) {
    %c0_i32 = arith.constant 0 : i32
    %c0_i32_0 = arith.constant 0 : i32
    return %arg0, %c0_i32 : i32, i32
  }
  func.func @transform_1(%arg0: i32) -> (i32, i32) {
    %c0_i32 = arith.constant 0 : i32
    %c0_i32_0 = arith.constant 0 : i32
    %c0_i32_1 = arith.constant 0 : i32
    return %c0_i32, %c0_i32_0 : i32, i32
  }
  func.func @transform_2(%arg0: i32) -> (i32, i32) {
    %c0_i32 = arith.constant 0 : i32
    %c0_i32_0 = arith.constant 0 : i32
    %c0_i32_1 = arith.constant 0 : i32
    return %c0_i32, %c0_i32_0 : i32, i32
  }
  func.func @transform_3(%arg0: i32) -> (i32, i32) {
    %c0_i32 = arith.constant 0 : i32
    %c0_i32_0 = arith.constant 0 : i32
    %c0_i32_1 = arith.constant 0 : i32
    return %c0_i32, %c0_i32_0 : i32, i32
  }
  func.func @transform_4(%arg0: i32) -> (i32, i32) {
    %c0_i32 = arith.constant 0 : i32
    %c0_i32_0 = arith.constant 0 : i32
    %c0_i32_1 = arith.constant 0 : i32
    return %c0_i32, %c0_i32_0 : i32, i32
  }
  func.func @transform_5(%arg0: i32) -> (i32, i32) {
    %c0_i32 = arith.constant 0 : i32
    %c0_i32_0 = arith.constant 0 : i32
    return %arg0, %c0_i32 : i32, i32
  }
}

module attributes {stable_mosaic.version = 11 : i64} {
  func.func @_encoder_kernel(%arg0: i32, %arg1: memref<8x32xf32, #tpu.memory_space<vmem>>, %arg2: memref<32x64xbf16, #tpu.memory_space<vmem>>, %arg3: memref<1x64xf32, #tpu.memory_space<vmem>>, %arg4: memref<64x16xbf16, #tpu.memory_space<vmem>>, %arg5: memref<1x16xf32, #tpu.memory_space<vmem>>, %arg6: memref<8x16xf32, #tpu.memory_space<vmem>>) attributes {dimension_semantics = [#tpu.dimension_semantics<parallel>], iteration_bounds = array<i64: 1>, scalar_prefetch = 0 : i64, scratch_operands = 0 : i64, tpu.core_type = #tpu.core_type<tc>, window_params = [{transform_indices = @transform_0, window_bounds = array<i64: 8, 32>}, {pipeline_mode = #tpu.pipeline_mode<synchronous>, transform_indices = @transform_1, window_bounds = array<i64: 32, 64>}, {pipeline_mode = #tpu.pipeline_mode<synchronous>, transform_indices = @transform_2, window_bounds = array<i64: 1, 64>}, {pipeline_mode = #tpu.pipeline_mode<synchronous>, transform_indices = @transform_3, window_bounds = array<i64: 64, 16>}, {pipeline_mode = #tpu.pipeline_mode<synchronous>, transform_indices = @transform_4, window_bounds = array<i64: 1, 16>}, {transform_indices = @transform_5, window_bounds = array<i64: 8, 16>}]} {
    %c0 = arith.constant 0 : index
    %c0_0 = arith.constant 0 : index
    %0 = vector.load %arg1[%c0, %c0_0] : memref<8x32xf32, #tpu.memory_space<vmem>>, vector<8x32xf32>
    %1 = arith.truncf %0 : vector<8x32xf32> to vector<8x32xbf16>
    %c0_1 = arith.constant 0 : index
    %c0_2 = arith.constant 0 : index
    %2 = vector.load %arg2[%c0_1, %c0_2] : memref<32x64xbf16, #tpu.memory_space<vmem>>, vector<32x64xbf16>
    %cst = arith.constant dense<0.000000e+00> : vector<8x64xf32>
    %3 = tpu.matmul %1, %2, %cst {dimension_numbers = #tpu.dot_dimension_numbers<[1], [0], [0], [1], [0, 0, 1, 1], [], []>} : vector<8x32xbf16>, vector<32x64xbf16>, vector<8x64xf32> -> vector<8x64xf32>
    %c0_3 = arith.constant 0 : index
    %c0_4 = arith.constant 0 : index
    %4 = vector.load %arg3[%c0_3, %c0_4] : memref<1x64xf32, #tpu.memory_space<vmem>>, vector<1x64xf32>
    %5 = vector.broadcast %4 : vector<1x64xf32> to vector<8x64xf32>
    %6 = arith.addf %3, %5 : vector<8x64xf32>
    %cst_5 = arith.constant 0.000000e+00 : f32
    %7 = vector.broadcast %cst_5 : f32 to vector<8x64xf32>
    %8 = arith.maximumf %6, %7 : vector<8x64xf32>
    %9 = arith.truncf %8 : vector<8x64xf32> to vector<8x64xbf16>
    %c0_6 = arith.constant 0 : index
    %c0_7 = arith.constant 0 : index
    %10 = vector.load %arg4[%c0_6, %c0_7] : memref<64x16xbf16, #tpu.memory_space<vmem>>, vector<64x16xbf16>
    %cst_8 = arith.constant dense<0.000000e+00> : vector<8x16xf32>
    %11 = tpu.matmul %9, %10, %cst_8 {dimension_numbers = #tpu.dot_dimension_numbers<[1], [0], [0], [1], [0, 0, 1, 1], [], []>} : vector<8x64xbf16>, vector<64x16xbf16>, vector<8x16xf32> -> vector<8x16xf32>
    %c0_9 = arith.constant 0 : index
    %c0_10 = arith.constant 0 : index
    %12 = vector.load %arg5[%c0_9, %c0_10] : memref<1x16xf32, #tpu.memory_space<vmem>>, vector<1x16xf32>
    %13 = vector.broadcast %12 : vector<1x16xf32> to vector<8x16xf32>
    %14 = arith.addf %11, %13 : vector<8x16xf32>
    %cst_11 = arith.constant 0.000000e+00 : f32
    %15 = vector.broadcast %cst_11 : f32 to vector<8x16xf32>
    %16 = arith.maximumf %14, %15 : vector<8x16xf32>
    %c0_12 = arith.constant 0 : index
    %c0_13 = arith.constant 0 : index
    %17 = vector.load %arg6[%c0_12, %c0_13] : memref<8x16xf32, #tpu.memory_space<vmem>>, vector<8x16xf32>
    tpu.vector_store %arg6[%c0_12, %c0_13], %16 {strides = array<i32>} : memref<8x16xf32, #tpu.memory_space<vmem>>, vector<8x16xf32>,
    return
  }
  func.func @transform_0(%arg0: i32) -> (i32, i32) {
    %c0_i32 = arith.constant 0 : i32
    %c0_i32_0 = arith.constant 0 : i32
    return %arg0, %c0_i32 : i32, i32
  }
  func.func @transform_1(%arg0: i32) -> (i32, i32) {
    %c0_i32 = arith.constant 0 : i32
    %c0_i32_0 = arith.constant 0 : i32
    %c0_i32_1 = arith.constant 0 : i32
    return %c0_i32, %c0_i32_0 : i32, i32
  }
  func.func @transform_2(%arg0: i32) -> (i32, i32) {
    %c0_i32 = arith.constant 0 : i32
    %c0_i32_0 = arith.constant 0 : i32
    %c0_i32_1 = arith.constant 0 : i32
    return %c0_i32, %c0_i32_0 : i32, i32
  }
  func.func @transform_3(%arg0: i32) -> (i32, i32) {
    %c0_i32 = arith.constant 0 : i32
    %c0_i32_0 = arith.constant 0 : i32
    %c0_i32_1 = arith.constant 0 : i32
    return %c0_i32, %c0_i32_0 : i32, i32
  }
  func.func @transform_4(%arg0: i32) -> (i32, i32) {
    %c0_i32 = arith.constant 0 : i32
    %c0_i32_0 = arith.constant 0 : i32
    %c0_i32_1 = arith.constant 0 : i32
    return %c0_i32, %c0_i32_0 : i32, i32
  }
  func.func @transform_5(%arg0: i32) -> (i32, i32) {
    %c0_i32 = arith.constant 0 : i32
    %c0_i32_0 = arith.constant 0 : i32
    return %arg0, %c0_i32 : i32, i32
  }
}

</mosaic_0001>

<bundles_post_ra>
// kernel: tpu_custom_call.1
= control target key start
LH: loop header
LB: loop body
LE: loop exit
PB: predicated region body
PF: predicated region fallthrough
CT: control target
= control target key end

     0   :  { %s257_s0 = inlined_call_operand.vmem [shape: f32[8,32], index: 0, kind: input, shape index: {}]   ;;  %s258_s1 = inlined_call_operand.vmem [shape: bf16[32,64], index: 1, kind: input, shape index: {}]   ;;  %s259_s2 = inlined_call_operand.vmem [shape: f32[1,64], index: 2, kind: input, shape index: {}]   ;;  %s260_s3 = inlined_call_operand.vmem [shape: bf16[64,16], index: 3, kind: input, shape index: {}]   ;;  %s261_s4 = inlined_call_operand.vmem [shape: f32[1,16], index: 4, kind: input, shape index: {}]   ;;  %s262_s5 = inlined_call_operand.hbm [shape: f32[8,16], index: 5, kind: output, shape index: {}]  }
   0x1   :  { %v162_v0 = vld [vmem:[%s258_s1 + $0x8] sm:$0xff]  ;;  %v161_v1 = vld [vmem:[%s258_s1] sm:$0xff]  ;;  %v166_v2 = vld [vmem:[%s260_s3 + $0x18] sm:$0xff] }
   0x2   :  { %54 = vmatpush.bf16.msra.mxu0 %v162_v0  ;;  %v22_v3 = vld [vmem:[%s257_s0] sm:$0xff] }
   0x3   :  { %10 = vsyncpa [#allocation3], 0  ;;  %107 = vmatpush.bf16.msra.mxu1 %v166_v2  ;;  %v165_v4 = vld [vmem:[%s260_s3 + $0x10] sm:$0xff]  ;;  %v23_v5 = vpack.c.bf16 %v22_v3, %v22_v3  ;;  %vm44_vm0 = vcmask 261120   ;;  %v164_v6 = vld [vmem:[%s260_s3 + $0x8] sm:$0xff]  ;;  %vm99_vm1 = vcmask 523264  }
   0x4   :  { %v163_v7 = vld [vmem:[%s260_s3] sm:$0xff]  ;;  %s196_s9 = smov [#allocation2]   ;;  %s126_s12 = sshll.u32 %s262_s5, 4  ;;  %vm117_vm2 = vcmask 130048   ;;  %s127_s12 = int_to_ptr.hbm [resolvable:$true] %s126_s12 }
   0x5   :  { %v168_v8 = vld [vmem:[%s259_s2] ss:$0 sm:$0xff]  ;;  %s124_s10 = sshll.u32 %s196_s9, 4  ;;  %s125_s10 = int_to_ptr.vmem [resolvable:$true] %s124_s10 }
   0x6   :  { %55 = vmatpush.bf16.msra.mxu0 %v161_v1  ;;  %v169_v14 = vld [vmem:[%s261_s4] ss:$0 sm:$0xff] }
   0x7   :  { %108 = vmatpush.bf16.msra.mxu1 %v165_v4 }
   0x9   :  { %143 = vmatmul.msk.bf16.vlgmr.msra.gmra.mxu0 %vm44_vm0, %v23_v5 }
   0xb   :  { %109 = vmatpush.bf16.msra.mxu1 %v164_v6 }
   0xf   :  { %110 = vmatpush.bf16.msra.mxu1 %v163_v7 }
  0x86   :  { %v57_v9 = vpop.f32.mrf.mxu0 }
  0x87   :  { %v58_v10 = vadd.f32 %v168_v8, %v57_v9 }
  0x89   :  { %v61_v11 = vmax.f32 %v58_v10, 0.0 }
  0x8b   :  { %v62_v12 = vpack.c.bf16 %v61_v11, %v61_v11 }
  0x8d   :  { %160 = vmatmul.msk.bf16.vlgmr.msra.gmra.mxu1 %vm99_vm1, %v62_v12 }
  0x8e   :  { %v59_v13 = vpop.f32.mrf.mxu0 }
 0x10a   :  { %v112_v15 = vpop.f32.mrf.mxu1 }
 0x10b   :  { %v113_v16 = vadd.f32 %v169_v14, %v112_v15 }
 0x10d   :  { %v116_v17 = vmax.f32 %v113_v16, 0.0 }
 0x10f   :  { %118 = vst.msk [vmem:[#allocation2] sm:$0xff] %vm117_vm2, %v116_v17 }
 0x110   :  { %129 = dma.vmem_to_hbm [thread:$0]  %s125_s10, 128, %s127_s12, [#allocation3]  }
 0x112   :  { %v114_v18 = vpop.f32.mrf.mxu1 }
 0x113   :  { %194 = dma.done.wait [#allocation3], 128  }
 0x114   :  { %195 = vsyncadd [#allocation3], 4294967168 }
 0x115   :  { %134 = vsyncpa [#allocation3], 1 }

// kernel: tpu_custom_call.1
= control target key start
LH: loop header
LB: loop body
LE: loop exit
PB: predicated region body
PF: predicated region fallthrough
CT: control target
= control target key end

     0   :  { %s257_s0 = inlined_call_operand.vmem [shape: f32[8,32], index: 0, kind: input, shape index: {}]   ;;  %s258_s1 = inlined_call_operand.vmem [shape: bf16[32,64], index: 1, kind: input, shape index: {}]   ;;  %s259_s2 = inlined_call_operand.vmem [shape: f32[1,64], index: 2, kind: input, shape index: {}]   ;;  %s260_s3 = inlined_call_operand.vmem [shape: bf16[64,16], index: 3, kind: input, shape index: {}]   ;;  %s261_s4 = inlined_call_operand.vmem [shape: f32[1,16], index: 4, kind: input, shape index: {}]   ;;  %s262_s5 = inlined_call_operand.hbm [shape: f32[8,16], index: 5, kind: output, shape index: {}]  }
   0x1   :  { %v162_v0 = vld [vmem:[%s258_s1 + $0x8] sm:$0xff]  ;;  %v161_v1 = vld [vmem:[%s258_s1] sm:$0xff]  ;;  %v166_v2 = vld [vmem:[%s260_s3 + $0x18] sm:$0xff] }
   0x2   :  { %54 = vmatpush.bf16.msra.mxu0 %v162_v0  ;;  %v22_v3 = vld [vmem:[%s257_s0] sm:$0xff] }
   0x3   :  { %10 = vsyncpa [#allocation3], 0  ;;  %107 = vmatpush.bf16.msra.mxu1 %v166_v2  ;;  %v165_v4 = vld [vmem:[%s260_s3 + $0x10] sm:$0xff]  ;;  %v23_v5 = vpack.c.bf16 %v22_v3, %v22_v3  ;;  %vm44_vm0 = vcmask 261120   ;;  %v164_v6 = vld [vmem:[%s260_s3 + $0x8] sm:$0xff]  ;;  %vm99_vm1 = vcmask 523264  }
   0x4   :  { %v163_v7 = vld [vmem:[%s260_s3] sm:$0xff]  ;;  %s196_s9 = smov [#allocation2]   ;;  %s126_s12 = sshll.u32 %s262_s5, 4  ;;  %vm117_vm2 = vcmask 130048   ;;  %s127_s12 = int_to_ptr.hbm [resolvable:$true] %s126_s12 }
   0x5   :  { %v168_v8 = vld [vmem:[%s259_s2] ss:$0 sm:$0xff]  ;;  %s124_s10 = sshll.u32 %s196_s9, 4  ;;  %s125_s10 = int_to_ptr.vmem [resolvable:$true] %s124_s10 }
   0x6   :  { %55 = vmatpush.bf16.msra.mxu0 %v161_v1  ;;  %v169_v14 = vld [vmem:[%s261_s4] ss:$0 sm:$0xff] }
   0x7   :  { %108 = vmatpush.bf16.msra.mxu1 %v165_v4 }
   0x9   :  { %143 = vmatmul.msk.bf16.vlgmr.msra.gmra.mxu0 %vm44_vm0, %v23_v5 }
   0xb   :  { %109 = vmatpush.bf16.msra.mxu1 %v164_v6 }
   0xf   :  { %110 = vmatpush.bf16.msra.mxu1 %v163_v7 }
  0x86   :  { %v57_v9 = vpop.f32.mrf.mxu0 }
  0x87   :  { %v58_v10 = vadd.f32 %v168_v8, %v57_v9 }
  0x89   :  { %v61_v11 = vmax.f32 %v58_v10, 0.0 }
  0x8b   :  { %v62_v12 = vpack.c.bf16 %v61_v11, %v61_v11 }
  0x8d   :  { %160 = vmatmul.msk.bf16.vlgmr.msra.gmra.mxu1 %vm99_vm1, %v62_v12 }
  0x8e   :  { %v59_v13 = vpop.f32.mrf.mxu0 }
 0x10a   :  { %v112_v15 = vpop.f32.mrf.mxu1 }
 0x10b   :  { %v113_v16 = vadd.f32 %v169_v14, %v112_v15 }
 0x10d   :  { %v116_v17 = vmax.f32 %v113_v16, 0.0 }
 0x10f   :  { %118 = vst.msk [vmem:[#allocation2] sm:$0xff] %vm117_vm2, %v116_v17 }
 0x110   :  { %129 = dma.vmem_to_hbm [thread:$0]  %s125_s10, 128, %s127_s12, [#allocation3]  }
 0x112   :  { %v114_v18 = vpop.f32.mrf.mxu1 }
 0x113   :  { %194 = dma.done.wait [#allocation3], 128  }
 0x114   :  { %195 = vsyncadd [#allocation3], 4294967168 }
 0x115   :  { %134 = vsyncpa [#allocation3], 1 }

</bundles_post_ra>
